<compile_context>
chip_gen: v7x
topology: tpu7x:2x2x1
jax: 0.10.0
libtpu: 0.0.40
codegen_flags: <defaults>
</compile_context>

<pallas_src>
import jax
import jax.numpy as jnp
from jax.experimental import pallas as pl
from jax.experimental.pallas import tpu as pltpu


def _round_up(x, m):
    return (x + m - 1) // m * m


def _lora_linear_kernel(scale):
    def kernel(x_ref, wlin_ref, wdown_ref, wup_ref, bias_ref, o_ref,
               acc_ref, down_ref):
        k = pl.program_id(2)

        @pl.when(k == 0)
        def _init():
            acc_ref[...] = jnp.zeros_like(acc_ref)
            down_ref[...] = jnp.zeros_like(down_ref)

        x = x_ref[...]                                            # (tm, tk)
        # Base path partial product: x_k @ Wlin_k   (weights already [in, out]).
        acc_ref[...] += jnp.dot(x, wlin_ref[...],
                                preferred_element_type=jnp.float32)
        # LoRA down partial product: x_k @ Wdown_k  (already [in, r_pad]).
        down_ref[...] += jnp.dot(x, wdown_ref[...],
                                 preferred_element_type=jnp.float32)

        @pl.when(k == pl.num_programs(2) - 1)
        def _finalize():
            # NOTE: the f32 "down" intermediate is cast to the compute dtype
            # before the up matmul (exact for f32; tiny rounding for bf16).
            up = jnp.dot(down_ref[...].astype(wup_ref.dtype), wup_ref[...],
                         preferred_element_type=jnp.float32)      # (tm, tn)
            out = acc_ref[...] + scale * up + bias_ref[...]
            o_ref[...] = out.astype(o_ref.dtype)

    return kernel


def lora_injected_linear(x, w_lin, w_down, w_up, bias=None, *, scale=1.0,
                         tm=256, tn=256, tk=512, compute_dtype=None):
    """LoRA-injected linear forward.

    x:      [..., in_features]
    w_lin:  [out_features, in_features]   (PyTorch nn.Linear layout)
    w_down: [r, in_features]
    w_up:   [out_features, r]
    bias:   optional [out_features]
    """
    *lead, in_features = x.shape
    out_features, in_f2 = w_lin.shape
    assert in_f2 == in_features
    r = w_down.shape[0]

    out_dtype = x.dtype
    cdt = jnp.dtype(compute_dtype) if compute_dtype is not None else jnp.dtype(x.dtype)

    x2d = x.reshape(-1, in_features).astype(cdt)
    M = x2d.shape[0]

    # Tile sizes: shrink to (padded) full extents for small problems.
    row_mult = 16 if cdt.itemsize < 4 else 8          # bf16 needs 16 sublanes
    tm_eff = min(tm, _round_up(M, row_mult))
    tn_eff = min(tn, _round_up(out_features, 128))
    tk_eff = min(tk, _round_up(in_features, 128))
    Mp = _round_up(M, tm_eff)
    Np = _round_up(out_features, tn_eff)
    Kp = _round_up(in_features, tk_eff)
    rp = _round_up(r, 128)                            # full-lane LoRA rank

    # Pad + pre-transpose ONCE in the wrapper; zero padding does not change
    # any matmul result, and padded output rows/cols are sliced off below.
    xp = jnp.pad(x2d, ((0, Mp - M), (0, Kp - in_features)))
    wlin_t = jnp.pad(w_lin.astype(cdt).T,
                     ((0, Kp - in_features), (0, Np - out_features)))
    wdown_t = jnp.pad(w_down.astype(cdt).T,
                      ((0, Kp - in_features), (0, rp - r)))
    wup_t = jnp.pad(w_up.astype(cdt).T,
                    ((0, rp - r), (0, Np - out_features)))
    if bias is None:
        bias2d = jnp.zeros((1, Np), jnp.float32)
    else:
        bias2d = jnp.pad(jnp.asarray(bias, jnp.float32).reshape(1, -1),
                         ((0, 0), (0, Np - out_features)))

    grid = (Mp // tm_eff, Np // tn_eff, Kp // tk_eff)

    itemsize = cdt.itemsize
    cost = pl.CostEstimate(
        flops=2 * M * in_features * out_features
              + 2 * M * in_features * r
              + 2 * M * r * out_features,
        transcendentals=0,
        bytes_accessed=(xp.size + wlin_t.size + wdown_t.size + wup_t.size)
                       * itemsize
                       + Mp * Np * jnp.dtype(out_dtype).itemsize,
    )

    out2d = pl.pallas_call(
        _lora_linear_kernel(float(scale)),
        out_shape=jax.ShapeDtypeStruct((Mp, Np), out_dtype),
        grid_spec=pltpu.PrefetchScalarGridSpec(
            num_scalar_prefetch=0,
            grid=grid,
            in_specs=[
                pl.BlockSpec((tm_eff, tk_eff), lambda i, j, k: (i, k)),  # x
                pl.BlockSpec((tk_eff, tn_eff), lambda i, j, k: (k, j)),  # W_lin^T
                pl.BlockSpec((tk_eff, rp),     lambda i, j, k: (k, 0)),  # W_down^T
                pl.BlockSpec((rp, tn_eff),     lambda i, j, k: (0, j)),  # W_up^T
                pl.BlockSpec((1, tn_eff),      lambda i, j, k: (0, j)),  # bias
            ],
            out_specs=pl.BlockSpec((tm_eff, tn_eff), lambda i, j, k: (i, j)),
            scratch_shapes=[
                pltpu.VMEM((tm_eff, tn_eff), jnp.float32),  # base accumulator
                pltpu.VMEM((tm_eff, rp), jnp.float32),      # LoRA down accumulator
            ],
        ),
        compiler_params=pltpu.CompilerParams(
            dimension_semantics=("parallel", "parallel", "arbitrary"),
            vmem_limit_bytes=32 * 1024 * 1024,
        ),
        cost_estimate=cost,
    )(xp, wlin_t, wdown_t, wup_t, bias2d)

    out2d = out2d[:M, :out_features]
    return out2d.reshape(*lead, out_features)


if __name__ == "__main__":
    # Module config (deterministic, small): in=32, out=32, r=4, bias=False
    in_features, out_features, r = 32, 32, 4
    scale = 1.0
    batch, seq = 2, 8

    key = jax.random.PRNGKey(0)
    kx, kw, kd, ku, kb = jax.random.split(key, 5)

    x = jax.random.normal(kx, (batch, seq, in_features), dtype=jnp.float32)
    # PyTorch nn.Linear weight layout: (out_features, in_features)
    w_lin = jax.random.normal(kw, (out_features, in_features), jnp.float32) * 0.05
    w_down = jax.random.normal(kd, (r, in_features), jnp.float32) * 0.05
    w_up = jax.random.normal(ku, (out_features, r), jnp.float32) * 0.05
    b = jax.random.normal(kb, (out_features,), jnp.float32) * 0.05

    # --- no bias (module default, bias=False) ---
    y = lora_injected_linear(x, w_lin, w_down, w_up, scale=scale)
    y = jax.block_until_ready(y)

    x2d = x.reshape(-1, in_features)
    ref = x2d @ w_lin.T + ((x2d @ w_down.T) @ w_up.T) * scale
    ref = ref.reshape(batch, seq, out_features)
    assert jnp.allclose(y, ref, atol=1e-4, rtol=1e-4), "mismatch vs reference (no bias)"

    # --- with bias (bias=True module variant) ---
    yb = lora_injected_linear(x, w_lin, w_down, w_up, bias=b, scale=scale)
    yb = jax.block_until_ready(yb)
    refb = ref + b.reshape(1, 1, out_features)
    assert jnp.allclose(yb, refb, atol=1e-4, rtol=1e-4), "mismatch vs reference (bias)"

    print("KERNEL_OK")
</pallas_src>

<mosaic_0001>
module attributes {stable_mosaic.version = 11 : i64} {
  func.func @kernel(%arg0: i32, %arg1: i32, %arg2: i32, %arg3: memref<16x128xf32, #tpu.memory_space<vmem>>, %arg4: memref<128x128xf32, #tpu.memory_space<vmem>>, %arg5: memref<128x128xf32, #tpu.memory_space<vmem>>, %arg6: memref<128x128xf32, #tpu.memory_space<vmem>>, %arg7: memref<1x128xf32, #tpu.memory_space<vmem>>, %arg8: memref<16x128xf32, #tpu.memory_space<vmem>>, %arg9: memref<16x128xf32, #tpu.memory_space<vmem>>, %arg10: memref<16x128xf32, #tpu.memory_space<vmem>>) attributes {dimension_semantics = [#tpu.dimension_semantics<parallel>, #tpu.dimension_semantics<parallel>, #tpu.dimension_semantics<arbitrary>], iteration_bounds = array<i64: 1, 1, 1>, scalar_prefetch = 0 : i64, scratch_operands = 2 : i64, tpu.core_type = #tpu.core_type<tc>, window_params = [{transform_indices = @transform_0, window_bounds = array<i64: 16, 128>}, {transform_indices = @transform_1, window_bounds = array<i64: 128, 128>}, {transform_indices = @transform_2, window_bounds = array<i64: 128, 128>}, {transform_indices = @transform_3, window_bounds = array<i64: 128, 128>}, {transform_indices = @transform_4, window_bounds = array<i64: 1, 128>}, {transform_indices = @transform_5, window_bounds = array<i64: 16, 128>}]} {
    %c0_i32 = arith.constant 0 : i32
    %0 = arith.cmpi eq, %arg2, %c0_i32 : i32
    %1 = arith.extui %0 : i1 to i32
    %c0_i32_0 = arith.constant 0 : i32
    %2 = arith.cmpi ne, %1, %c0_i32_0 : i32
    scf.if %2 {
      %cst_17 = arith.constant 0.000000e+00 : f32
      %17 = vector.broadcast %cst_17 : f32 to vector<16x128xf32>
      %c0_18 = arith.constant 0 : index
      %c0_19 = arith.constant 0 : index
      %18 = vector.load %arg9[%c0_18, %c0_19] : memref<16x128xf32, #tpu.memory_space<vmem>>, vector<16x128xf32>
      tpu.vector_store %arg9[%c0_18, %c0_19], %17 {strides = array<i32>} : memref<16x128xf32, #tpu.memory_space<vmem>>, vector<16x128xf32>,
      %cst_20 = arith.constant 0.000000e+00 : f32
      %19 = vector.broadcast %cst_20 : f32 to vector<16x128xf32>
      %c0_21 = arith.constant 0 : index
      %c0_22 = arith.constant 0 : index
      %20 = vector.load %arg10[%c0_21, %c0_22] : memref<16x128xf32, #tpu.memory_space<vmem>>, vector<16x128xf32>
      tpu.vector_store %arg10[%c0_21, %c0_22], %19 {strides = array<i32>} : memref<16x128xf32, #tpu.memory_space<vmem>>, vector<16x128xf32>,
    } else {
    }
    %c0 = arith.constant 0 : index
    %c0_1 = arith.constant 0 : index
    %3 = vector.load %arg3[%c0, %c0_1] : memref<16x128xf32, #tpu.memory_space<vmem>>, vector<16x128xf32>
    %c0_2 = arith.constant 0 : index
    %c0_3 = arith.constant 0 : index
    %4 = vector.load %arg9[%c0_2, %c0_3] : memref<16x128xf32, #tpu.memory_space<vmem>>, vector<16x128xf32>
    %c0_4 = arith.constant 0 : index
    %c0_5 = arith.constant 0 : index
    %5 = vector.load %arg4[%c0_4, %c0_5] : memref<128x128xf32, #tpu.memory_space<vmem>>, vector<128x128xf32>
    %cst = arith.constant dense<0.000000e+00> : vector<16x128xf32>
    %6 = tpu.matmul %3, %5, %cst {dimension_numbers = #tpu.dot_dimension_numbers<[1], [0], [0], [1], [0, 0, 1, 1], [], []>} : vector<16x128xf32>, vector<128x128xf32>, vector<16x128xf32> -> vector<16x128xf32>
    %7 = arith.addf %4, %6 : vector<16x128xf32>
    %c0_6 = arith.constant 0 : index
    %c0_7 = arith.constant 0 : index
    %8 = vector.load %arg9[%c0_6, %c0_7] : memref<16x128xf32, #tpu.memory_space<vmem>>, vector<16x128xf32>
    tpu.vector_store %arg9[%c0_6, %c0_7], %7 {strides = array<i32>} : memref<16x128xf32, #tpu.memory_space<vmem>>, vector<16x128xf32>,
    %c0_8 = arith.constant 0 : index
    %c0_9 = arith.constant 0 : index
    %9 = vector.load %arg10[%c0_8, %c0_9] : memref<16x128xf32, #tpu.memory_space<vmem>>, vector<16x128xf32>
    %c0_10 = arith.constant 0 : index
    %c0_11 = arith.constant 0 : index
    %10 = vector.load %arg5[%c0_10, %c0_11] : memref<128x128xf32, #tpu.memory_space<vmem>>, vector<128x128xf32>
    %cst_12 = arith.constant dense<0.000000e+00> : vector<16x128xf32>
    %11 = tpu.matmul %3, %10, %cst_12 {dimension_numbers = #tpu.dot_dimension_numbers<[1], [0], [0], [1], [0, 0, 1, 1], [], []>} : vector<16x128xf32>, vector<128x128xf32>, vector<16x128xf32> -> vector<16x128xf32>
    %12 = arith.addf %9, %11 : vector<16x128xf32>
    %c0_13 = arith.constant 0 : index
    %c0_14 = arith.constant 0 : index
    %13 = vector.load %arg10[%c0_13, %c0_14] : memref<16x128xf32, #tpu.memory_space<vmem>>, vector<16x128xf32>
    tpu.vector_store %arg10[%c0_13, %c0_14], %12 {strides = array<i32>} : memref<16x128xf32, #tpu.memory_space<vmem>>, vector<16x128xf32>,
    %c0_i32_15 = arith.constant 0 : i32
    %14 = arith.cmpi eq, %arg2, %c0_i32_15 : i32
    %15 = arith.extui %14 : i1 to i32
    %c0_i32_16 = arith.constant 0 : i32
    %16 = arith.cmpi ne, %15, %c0_i32_16 : i32
    scf.if %16 {
      %c0_17 = arith.constant 0 : index
      %c0_18 = arith.constant 0 : index
      %17 = vector.load %arg10[%c0_17, %c0_18] : memref<16x128xf32, #tpu.memory_space<vmem>>, vector<16x128xf32>
      %c0_19 = arith.constant 0 : index
      %c0_20 = arith.constant 0 : index
      %18 = vector.load %arg6[%c0_19, %c0_20] : memref<128x128xf32, #tpu.memory_space<vmem>>, vector<128x128xf32>
      %cst_21 = arith.constant dense<0.000000e+00> : vector<16x128xf32>
      %19 = tpu.matmul %17, %18, %cst_21 {dimension_numbers = #tpu.dot_dimension_numbers<[1], [0], [0], [1], [0, 0, 1, 1], [], []>} : vector<16x128xf32>, vector<128x128xf32>, vector<16x128xf32> -> vector<16x128xf32>
      %c0_22 = arith.constant 0 : index
      %c0_23 = arith.constant 0 : index
      %20 = vector.load %arg9[%c0_22, %c0_23] : memref<16x128xf32, #tpu.memory_space<vmem>>, vector<16x128xf32>
      %cst_24 = arith.constant 1.000000e+00 : f32
      %21 = vector.broadcast %cst_24 : f32 to vector<16x128xf32>
      %22 = arith.mulf %21, %19 : vector<16x128xf32>
      %23 = arith.addf %20, %22 : vector<16x128xf32>
      %c0_25 = arith.constant 0 : index
      %c0_26 = arith.constant 0 : index
      %24 = vector.load %arg7[%c0_25, %c0_26] : memref<1x128xf32, #tpu.memory_space<vmem>>, vector<1x128xf32>
      %25 = vector.broadcast %24 : vector<1x128xf32> to vector<16x128xf32>
      %26 = arith.addf %23, %25 : vector<16x128xf32>
      %c0_27 = arith.constant 0 : index
      %c0_28 = arith.constant 0 : index
      %27 = vector.load %arg8[%c0_27, %c0_28] : memref<16x128xf32, #tpu.memory_space<vmem>>, vector<16x128xf32>
      tpu.vector_store %arg8[%c0_27, %c0_28], %26 {strides = array<i32>} : memref<16x128xf32, #tpu.memory_space<vmem>>, vector<16x128xf32>,
    } else {
    }
    return
  }
  func.func @transform_0(%arg0: i32, %arg1: i32, %arg2: i32) -> (i32, i32) {
    %c0_i32 = arith.constant 0 : i32
    return %arg0, %arg2 : i32, i32
  }
  func.func @transform_1(%arg0: i32, %arg1: i32, %arg2: i32) -> (i32, i32) {
    %c0_i32 = arith.constant 0 : i32
    return %arg2, %arg1 : i32, i32
  }
  func.func @transform_2(%arg0: i32, %arg1: i32, %arg2: i32) -> (i32, i32) {
    %c0_i32 = arith.constant 0 : i32
    %c0_i32_0 = arith.constant 0 : i32
    return %arg2, %c0_i32 : i32, i32
  }
  func.func @transform_3(%arg0: i32, %arg1: i32, %arg2: i32) -> (i32, i32) {
    %c0_i32 = arith.constant 0 : i32
    %c0_i32_0 = arith.constant 0 : i32
    return %c0_i32, %arg1 : i32, i32
  }
  func.func @transform_4(%arg0: i32, %arg1: i32, %arg2: i32) -> (i32, i32) {
    %c0_i32 = arith.constant 0 : i32
    %c0_i32_0 = arith.constant 0 : i32
    return %c0_i32, %arg1 : i32, i32
  }
  func.func @transform_5(%arg0: i32, %arg1: i32, %arg2: i32) -> (i32, i32) {
    %c0_i32 = arith.constant 0 : i32
    return %arg0, %arg1 : i32, i32
  }
}

</mosaic_0001>

<bundles_post_ra>
// kernel: tpu_custom_call.1
= control target key start
LH: loop header
LB: loop body
LE: loop exit
PB: predicated region body
PF: predicated region fallthrough
CT: control target
= control target key end

     0   :  { %10 = vsyncpa [#allocation5], 0  ;;  %s922_s0 = inlined_call_operand.hbm [shape: f32[16,128], index: 0, kind: input, shape index: {}]   ;;  %s923_s1 = inlined_call_operand.hbm [shape: f32[128,128], index: 1, kind: input, shape index: {}]   ;;  %s924_s2 = inlined_call_operand.hbm [shape: f32[128,128], index: 2, kind: input, shape index: {}]   ;;  %s925_s3 = inlined_call_operand.hbm [shape: f32[128,128], index: 3, kind: input, shape index: {}]   ;;  %s926_s4 = inlined_call_operand.vmem [shape: f32[1,128], index: 4, kind: input, shape index: {}]   ;;  %s927_s5 = inlined_call_operand.hbm [shape: f32[16,128], index: 5, kind: output, shape index: {}]  }
   0x1   :  { %11 = vsyncpa [#allocation8], 0 }
   0x2   :  { %12 = vsyncpa [#allocation11], 0 }
   0x3   :  { %13 = vsyncpa [#allocation6], 0  ;;  %s793_s18 = smov [#allocation7]   ;;  %s794_s20 = smov [#allocation4]  }
   0x4   :  { %s31_s19 = sshll.u32 %s793_s18, 4  ;;  %s19_s21 = sshll.u32 %s794_s20, 4  ;;  %s32_s19 = int_to_ptr.vmem [resolvable:$true] %s31_s19  ;;  %s830_s21 = int_to_ptr.vmem [resolvable:$true] %s19_s21 }
   0x5   :  { %s675_s24 = scalar_lea.hbm %s923_s1, 2048 }
   0x6   :  { %p676_p0 = scmp.ne.s32.totalorder %s923_s1, %s675_s24  ;;  %p679_p1 = scmp.lt.u32.totalorder %s675_s24, %s923_s1 }
   0x8   :  { %p681_p2 = pnand %p679_p1, %p676_p0 }
   0xa   :  { %684 = shalt.err (!%p681_p2)
}
   0xb   :  { %s685_s29 = scalar_lea.vmem %s32_s19, 2048  ;;  %p690_p4 = scmp.lt.s32.totalorder %s32_s19, %s32_s19 }
   0xc   :  { %p686_p3 = scmp.ne.s32.totalorder %s32_s19, %s685_s29  ;;  %p691_p5 = scmp.lt.s32.totalorder %s685_s29, %s685_s29 }
   0xe   :  { %p692_p6 = por %p691_p5, %p690_p4 }
  0x10   :  { %p693_p7 = pnand %p692_p6, %p686_p3 }
  0x12   :  { %696 = shalt.err (!%p693_p7)
}
  0x13   :  { %s795_s30 = smov 128   ;;  %s796_s6 = smov 8  }
  0x14   :  { %37 = dma.hbm_to_vmem [thread:$0]  %s923_s1, 2048, %s32_s19, [#allocation8], %s795_s30, %s795_s30, %s796_s6  }
  0x15   :  { %s697_s11 = scalar_lea.hbm %s922_s0, 256 }
  0x16   :  { %p698_p8 = scmp.ne.s32.totalorder %s922_s0, %s697_s11  ;;  %p701_p9 = scmp.lt.u32.totalorder %s697_s11, %s922_s0 }
  0x18   :  { %p703_p10 = pnand %p701_p9, %p698_p8 }
  0x1a   :  { %706 = shalt.err (!%p703_p10)
}
  0x1b   :  { %s707_s16 = scalar_lea.vmem %s830_s21, 256  ;;  %p712_p12 = scmp.lt.s32.totalorder %s830_s21, %s830_s21 }
  0x1c   :  { %p708_p11 = scmp.ne.s32.totalorder %s830_s21, %s707_s16  ;;  %p713_p13 = scmp.lt.s32.totalorder %s707_s16, %s707_s16 }
  0x1e   :  { %p714_p0 = por %p713_p13, %p712_p12 }
  0x20   :  { %p715_p1 = pnand %p714_p0, %p708_p11 }
  0x22   :  { %718 = shalt.err (!%p715_p1)
}
  0x23   :  { %25 = dma.hbm_to_vmem [thread:$0]  %s922_s0, 256, %s830_s21, [#allocation5], %s795_s30, %s795_s30, %s796_s6  }
  0x24   :  { %s797_s18 = smov [#allocation9]   ;;  %s798_s20 = smov [#allocation10]  }
  0x25   :  { %s43_s19 = sshll.u32 %s797_s18, 4  ;;  %s55_s22 = sshll.u32 %s798_s20, 4  ;;  %s44_s19 = int_to_ptr.vmem [resolvable:$true] %s43_s19  ;;  %s867_s22 = int_to_ptr.vmem [resolvable:$true] %s55_s22 }
  0x26   :  { %s719_s25 = scalar_lea.hbm %s924_s2, 2048 }
  0x27   :  { %p720_p2 = scmp.ne.s32.totalorder %s924_s2, %s719_s25  ;;  %p723_p3 = scmp.lt.u32.totalorder %s719_s25, %s924_s2 }
  0x29   :  { %p725_p4 = pnand %p723_p3, %p720_p2 }
  0x2b   :  { %728 = shalt.err (!%p725_p4)
}
  0x2c   :  { %s729_s0 = scalar_lea.vmem %s44_s19, 2048  ;;  %p734_p6 = scmp.lt.s32.totalorder %s44_s19, %s44_s19 }
  0x2d   :  { %p730_p5 = scmp.ne.s32.totalorder %s44_s19, %s729_s0  ;;  %p735_p7 = scmp.lt.s32.totalorder %s729_s0, %s729_s0 }
  0x2f   :  { %p736_p8 = por %p735_p7, %p734_p6 }
  0x31   :  { %p737_p9 = pnand %p736_p8, %p730_p5 }
  0x33   :  { %740 = shalt.err (!%p737_p9)
}
  0x34   :  { %49 = dma.hbm_to_vmem [thread:$0]  %s924_s2, 2048, %s44_s19, [#allocation8], %s795_s30, %s795_s30, %s796_s6  }
  0x35   :  { %s741_s10 = scalar_lea.hbm %s925_s3, 2048 }
  0x36   :  { %p742_p10 = scmp.ne.s32.totalorder %s925_s3, %s741_s10  ;;  %p745_p11 = scmp.lt.u32.totalorder %s741_s10, %s925_s3 }
  0x38   :  { %p747_p12 = pnand %p745_p11, %p742_p10 }
  0x3a   :  { %750 = shalt.err (!%p747_p12)
}
  0x3b   :  { %s751_s15 = scalar_lea.vmem %s867_s22, 2048  ;;  %p756_p0 = scmp.lt.s32.totalorder %s867_s22, %s867_s22 }
  0x3c   :  { %p752_p13 = scmp.ne.s32.totalorder %s867_s22, %s751_s15  ;;  %p757_p1 = scmp.lt.s32.totalorder %s751_s15, %s751_s15 }
  0x3e   :  { %p758_p2 = por %p757_p1, %p756_p0 }
  0x40   :  { %p759_p3 = pnand %p758_p2, %p752_p13 }
  0x42   :  { %762 = shalt.err (!%p759_p3)
}
  0x43   :  { %61 = dma.hbm_to_vmem [thread:$0]  %s925_s3, 2048, %s867_s22, [#allocation11], %s795_s30, %s795_s30, %s796_s6  }
  0x44   :  { %785 = dma.done.wait [#allocation5], 256  }
  0x45   :  { %786 = vsyncadd [#allocation5], 4294967040 }
  0x46   :  { %787 = dma.done.wait [#allocation8], 4096  }
  0x47   :  { %788 = vsyncadd [#allocation8], 4294963200 }
  0x48   :  { %789 = dma.done.wait [#allocation11], 2048  }
  0x49   :  { %790 = vsyncadd [#allocation11], 4294965248  ;;  %v185_v0 = vld [vmem:[#allocation9] sm:$0xff]  ;;  %v186_v1 = vld [vmem:[#allocation9 + $0x8] sm:$0xff]  ;;  %s799_s17 = smov [#allocation12]  }
  0x4a   :  { %v187_v2 = vld [vmem:[#allocation9 + $0x10] sm:$0xff]  ;;  %v602_v3 = vpack.c.bf16 %v186_v1, %v185_v0  ;;  %v188_v4 = vld [vmem:[#allocation9 + $0x18] sm:$0xff]  ;;  %v189_v6 = vld [vmem:[#allocation9 + $0x20] sm:$0xff]  ;;  %s396_s18 = sshll.u32 %s799_s17, 4  ;;  %s397_s18 = int_to_ptr.vmem [resolvable:$true] %s396_s18 }
  0x4b   :  { %v606_v5 = vpack.c.bf16 %v188_v4, %v187_v2  ;;  %v190_v7 = vld [vmem:[#allocation9 + $0x28] sm:$0xff]  ;;  %v191_v9 = vld [vmem:[#allocation9 + $0x30] sm:$0xff]  ;;  %v192_v10 = vld [vmem:[#allocation9 + $0x38] sm:$0xff]  ;;  %s763_s19 = scalar_lea.vmem %s397_s18, 256  ;;  %p768_p5 = scmp.lt.s32.totalorder %s397_s18, %s397_s18 }
  0x4c   :  { %603 = vmatprep.subr.bf16.mxu1 %v602_v3  ;;  %v610_v8 = vpack.c.bf16 %v190_v7, %v189_v6  ;;  %v84_v11 = vld [vmem:[#allocation4] sm:$0xff]  ;;  %v88_v12 = vld [vmem:[#allocation7] sm:$0xff]  ;;  %v89_v13 = vld [vmem:[#allocation7 + $0x8] sm:$0xff]  ;;  %v614_v20 = vpack.c.bf16 %v192_v10, %v191_v9  ;;  %p764_p4 = scmp.ne.s32.totalorder %s397_s18, %s763_s19  ;;  %p769_p6 = scmp.lt.s32.totalorder %s763_s19, %s763_s19 }
  0x4d   :  { %605 = vmatpush3.bf16.msra.mxu1 %v602_v3  ;;  %532 = vmatprep.mubr.f32.mxu1 %v84_v11  ;;  %v90_v14 = vld [vmem:[#allocation7 + $0x10] sm:$0xff]  ;;  %v570_v15 = vpack.c.bf16 %v89_v13, %v88_v12  ;;  %v91_v16 = vld [vmem:[#allocation7 + $0x18] sm:$0xff]  ;;  %v92_v18 = vld [vmem:[#allocation7 + $0x20] sm:$0xff] }
  0x4e   :  { %607 = vmatprep.subr.bf16.mxu1 %v606_v5  ;;  %497 = vmatprep.mubr.f32.mxu0 %v84_v11  ;;  %v574_v17 = vpack.c.bf16 %v91_v16, %v90_v14  ;;  %v93_v19 = vld [vmem:[#allocation7 + $0x28] sm:$0xff]  ;;  %v193_v21 = vld [vmem:[#allocation9 + $0x40] sm:$0xff]  ;;  %v94_v24 = vld [vmem:[#allocation7 + $0x30] sm:$0xff]  ;;  %p770_p7 = por %p769_p6, %p768_p5 }
  0x4f   :  { %571 = vmatprep.subr.bf16.mxu0 %v570_v15  ;;  %v194_v22 = vld [vmem:[#allocation9 + $0x48] sm:$0xff]  ;;  %v578_v23 = vpack.c.bf16 %v93_v19, %v92_v18  ;;  %v95_v25 = vld [vmem:[#allocation7 + $0x38] sm:$0xff]  ;;  %v195_v27 = vld [vmem:[#allocation9 + $0x50] sm:$0xff] }
  0x50   :  { %573 = vmatpush3.bf16.msra.mxu0 %v570_v15  ;;  %v618_v26 = vpack.c.bf16 %v194_v22, %v193_v21  ;;  %v196_v28 = vld [vmem:[#allocation9 + $0x58] sm:$0xff]  ;;  %v582_v29 = vpack.c.bf16 %v95_v25, %v94_v24  ;;  %v96_v30 = vld [vmem:[#allocation7 + $0x40] sm:$0xff]  ;;  %v97_v31 = vld [vmem:[#allocation7 + $0x48] sm:$0xff]  ;;  %p771_p8 = pnand %p770_p7, %p764_p4 }
  0x51   :  { %609 = vmatpush3.bf16.msra.mxu1 %v606_v5  ;;  %575 = vmatprep.subr.bf16.mxu0 %v574_v17  ;;  %v622_v32 = vpack.c.bf16 %v196_v28, %v195_v27  ;;  %v197_v33 = vld [vmem:[#allocation9 + $0x60] sm:$0xff]  ;;  %v198_v34 = vld [vmem:[#allocation9 + $0x68] sm:$0xff]  ;;  %v586_v35 = vpack.c.bf16 %v97_v31, %v96_v30  ;;  %v98_v36 = vld [vmem:[#allocation7 + $0x50] sm:$0xff] }
  0x52   :  { %611 = vmatprep.subr.bf16.mxu1 %v610_v8  ;;  %v99_v37 = vld [vmem:[#allocation7 + $0x58] sm:$0xff]  ;;  %v626_v38 = vpack.c.bf16 %v198_v34, %v197_v33  ;;  %v199_v39 = vld [vmem:[#allocation9 + $0x70] sm:$0xff]  ;;  %v100_v42 = vld [vmem:[#allocation7 + $0x60] sm:$0xff] }
  0x53   :  { %v200_v40 = vld [vmem:[#allocation9 + $0x78] sm:$0xff]  ;;  %v590_v41 = vpack.c.bf16 %v99_v37, %v98_v36  ;;  %v101_v43 = vld [vmem:[#allocation7 + $0x68] sm:$0xff]  ;;  %v102_v46 = vld [vmem:[#allocation7 + $0x70] sm:$0xff] }
  0x54   :  { %577 = vmatpush3.bf16.msra.mxu0 %v574_v17  ;;  %v630_v44 = vpack.c.bf16 %v200_v40, %v199_v39  ;;  %v594_v45 = vpack.c.bf16 %v101_v43, %v100_v42  ;;  %v103_v47 = vld [vmem:[#allocation7 + $0x78] sm:$0xff]  ;;  %v285_v50 = vld [vmem:[#allocation10] sm:$0xff]  ;;  %v286_v51 = vld [vmem:[#allocation10 + $0x8] sm:$0xff] }
  0x55   :  { %613 = vmatpush3.bf16.msra.mxu1 %v610_v8  ;;  %579 = vmatprep.subr.bf16.mxu0 %v578_v23  ;;  %v598_v48 = vpack.c.bf16 %v103_v47, %v102_v46  ;;  %v85_v49 = vld [vmem:[#allocation4 + $0x8] sm:$0xff]  ;;  %v634_v52 = vpack.c.bf16 %v286_v51, %v285_v50  ;;  %v287_v53 = vld [vmem:[#allocation10 + $0x10] sm:$0xff]  ;;  %v289_v56 = vld [vmem:[#allocation10 + $0x20] sm:$0xff] }
  0x56   :  { %615 = vmatprep.subr.bf16.mxu1 %v614_v20  ;;  %v288_v54 = vld [vmem:[#allocation10 + $0x18] sm:$0xff]  ;;  %v290_v57 = vld [vmem:[#allocation10 + $0x28] sm:$0xff]  ;;  %v291_v59 = vld [vmem:[#allocation10 + $0x30] sm:$0xff] }
  0x57   :  { %v638_v55 = vpack.c.bf16 %v288_v54, %v287_v53  ;;  %v642_v58 = vpack.c.bf16 %v290_v57, %v289_v56  ;;  %v292_v60 = vld [vmem:[#allocation10 + $0x38] sm:$0xff]  ;;  %v293_v62 = vld [vmem:[#allocation10 + $0x40] sm:$0xff]  ;;  %v294_v63 = vld [vmem:[#allocation10 + $0x48] sm:$0xff] }
  0x58   :  { %581 = vmatpush3.bf16.msra.mxu0 %v578_v23  ;;  %v646_v61 = vpack.c.bf16 %v292_v60, %v291_v59  ;;  %v650_v0 = vpack.c.bf16 %v294_v63, %v293_v62  ;;  %v295_v1 = vld [vmem:[#allocation10 + $0x50] sm:$0xff]  ;;  %v296_v2 = vld [vmem:[#allocation10 + $0x58] sm:$0xff]  ;;  %v297_v4 = vld [vmem:[#allocation10 + $0x60] sm:$0xff] }
  0x59   :  { %617 = vmatpush3.bf16.msra.mxu1 %v614_v20  ;;  %583 = vmatprep.subr.bf16.mxu0 %v582_v29  ;;  %v654_v3 = vpack.c.bf16 %v296_v2, %v295_v1  ;;  %v298_v5 = vld [vmem:[#allocation10 + $0x68] sm:$0xff]  ;;  %v299_v7 = vld [vmem:[#allocation10 + $0x70] sm:$0xff]  ;;  %v300_v8 = vld [vmem:[#allocation10 + $0x78] sm:$0xff] }
  0x5a   :  { %619 = vmatprep.subr.bf16.mxu1 %v618_v26  ;;  %v658_v6 = vpack.c.bf16 %v298_v5, %v297_v4  ;;  %v662_v9 = vpack.c.bf16 %v300_v8, %v299_v7  ;;  %v410_v12 = vld [vmem:[%s926_s4] ss:$0 sm:$0xff] }
  0x5c   :  { %585 = vmatpush3.bf16.msra.mxu0 %v582_v29 }
  0x5d   :  { %621 = vmatpush3.bf16.msra.mxu1 %v618_v26  ;;  %587 = vmatprep.subr.bf16.mxu0 %v586_v35 }
  0x5e   :  { %623 = vmatprep.subr.bf16.mxu1 %v622_v32 }
  0x60   :  { %589 = vmatpush3.bf16.msra.mxu0 %v586_v35 }
  0x61   :  { %625 = vmatpush3.bf16.msra.mxu1 %v622_v32  ;;  %591 = vmatprep.subr.bf16.mxu0 %v590_v41 }
  0x62   :  { %627 = vmatprep.subr.bf16.mxu1 %v626_v38 }
  0x64   :  { %593 = vmatpush3.bf16.msra.mxu0 %v590_v41 }
  0x65   :  { %629 = vmatpush3.bf16.msra.mxu1 %v626_v38  ;;  %595 = vmatprep.subr.bf16.mxu0 %v594_v45 }
  0x66   :  { %631 = vmatprep.subr.bf16.mxu1 %v630_v44 }
  0x68   :  { %597 = vmatpush3.bf16.msra.mxu0 %v594_v45 }
  0x69   :  { %633 = vmatpush3.bf16.msra.mxu1 %v630_v44  ;;  %599 = vmatprep.subr.bf16.mxu0 %v598_v48 }
  0x6c   :  { %533 = vmatmul.mubr.f32.vlgmr.msra.gmra.mrb[0].mxu1 %v85_v49  ;;  %601 = vmatpush3.bf16.msra.mxu0 %v598_v48 }
  0x6d   :  { %635 = vmatprep.subr.bf16.mxu0 %v634_v52 }
  0x6f   :  { %498 = vmatmul.mubr.f32.vlgmr.msra.gmra.mrb[0].mxu0 %v85_v49 }
  0x70   :  { %637 = vmatpush3.bf16.msra.mxu0 %v634_v52 }
  0x71   :  { %639 = vmatprep.subr.bf16.mxu0 %v638_v55 }
  0x74   :  { %641 = vmatpush3.bf16.msra.mxu0 %v638_v55 }
  0x75   :  { %643 = vmatprep.subr.bf16.mxu0 %v642_v58 }
  0x78   :  { %645 = vmatpush3.bf16.msra.mxu0 %v642_v58 }
  0x79   :  { %647 = vmatprep.subr.bf16.mxu0 %v646_v61 }
  0x7c   :  { %649 = vmatpush3.bf16.msra.mxu0 %v646_v61 }
  0x7d   :  { %651 = vmatprep.subr.bf16.mxu0 %v650_v0 }
  0x80   :  { %653 = vmatpush3.bf16.msra.mxu0 %v650_v0 }
  0x81   :  { %655 = vmatprep.subr.bf16.mxu0 %v654_v3 }
  0x84   :  { %657 = vmatpush3.bf16.msra.mxu0 %v654_v3 }
  0x85   :  { %659 = vmatprep.subr.bf16.mxu0 %v658_v6 }
  0x88   :  { %661 = vmatpush3.bf16.msra.mxu0 %v658_v6 }
  0x89   :  { %663 = vmatprep.subr.bf16.mxu0 %v662_v9 }
  0x8c   :  { %665 = vmatpush3.bf16.msra.mxu0 %v662_v9 }
 0x13f   :  { %v534_v10 = vpop.f32.mrb[0].mxu1 }
 0x140   :  { %v267_v11 = vpop.f32.mrb[1].mxu1 }
 0x141   :  { %567 = vmatprep.mubr.f32.mxu0 %v267_v11 }
 0x142   :  { %568 = vmatmul.mubr.f32.vlgmr.msra.gmra.mrb[0].mxu0 %v534_v10 }
 0x215   :  { %v569_v13 = vpop.f32.mrb[0].mxu0 }
 0x216   :  { %v388_v14 = vadd.f32 %v569_v13, %v410_v12  ;;  %v367_v15 = vpop.f32.mrb[1].mxu0 }
 0x217   :  { %v387_v16 = vadd.f32 %v410_v12, %v367_v15 }
 0x218   :  { %390 = vst [vmem:[#allocation12 + $0x8] sm:$0xff] %v388_v14 }
 0x219   :  { %389 = vst [vmem:[#allocation12] sm:$0xff] %v387_v16 }
 0x21a   :  { %774 = shalt.err (!%p771_p8)
}
 0x21b   :  { %s775_s4 = scalar_lea.hbm %s927_s5, 256 }
 0x21c   :  { %p776_p9 = scmp.ne.s32.totalorder %s927_s5, %s775_s4  ;;  %p779_p10 = scmp.lt.u32.totalorder %s775_s4, %s927_s5 }
 0x21e   :  { %p781_p11 = pnand %p779_p10, %p776_p9 }
 0x220   :  { %784 = shalt.err (!%p781_p11)
}
 0x221   :  { %402 = dma.vmem_to_hbm [thread:$0]  %s397_s18, 256, %s927_s5, [#allocation6], %s795_s30, %s795_s30, %s796_s6  }
 0x222   :  { %791 = dma.done.wait [#allocation6], 256  }
 0x223   :  { %792 = vsyncadd [#allocation6], 4294967040 }
 0x224   :  { %406 = vsyncpa [#allocation5], 1 }
 0x225   :  { %407 = vsyncpa [#allocation8], 1 }
 0x226   :  { %408 = vsyncpa [#allocation11], 1 }
 0x227   :  { %409 = vsyncpa [#allocation6], 1 }

</bundles_post_ra>
